<compile_context>
chip_gen: v7x
topology: tpu7x:2x2x1
jax: 0.10.0
libtpu: 0.0.40
codegen_flags: <defaults>
</compile_context>

<pallas_src>
import functools
import math

import jax
import jax.numpy as jnp
from jax import lax
from jax.experimental import pallas as pl
from jax.experimental.pallas import tpu as pltpu

_LANE = 128
_MIB = 1024 * 1024


def _dist_transform_kernel(x_ref, w1_ref, b1_ref, w2_ref, b2_ref, o_ref, *,
                           n_steps, n_units, row_chunk, n_chunks,
                           max_unroll_steps, step_unroll, compute_dtype):
    """All n_steps residual blocks applied to one (bt, Fp) batch tile."""
    cdt = compute_dtype

    def residual_step(x, get_w1, get_b1, get_w2, b2_row):
        # x: f32 (rows, Fp) residual carry.  Inner math may run in bf16 on
        # v6e/v7x; the carry and final accumulation stay in f32.
        xc = x.astype(cdt)
        h = jnp.maximum(get_w1(0) * xc + get_b1(0), 0.0)
        y = get_w2(0) * h
        for u in range(1, n_units):
            h = jnp.maximum(get_w1(u) * xc + get_b1(u), 0.0)
            y = y + get_w2(u) * h
        return x + (y.astype(jnp.float32) + b2_row)

    def run_steps(x):
        if n_steps <= max_unroll_steps:
            # Fully unrolled: per-(step, unit) weight rows are read straight
            # from VMEM (bounded vreg liveness, full LLO visibility).
            for s in range(n_steps):
                x = residual_step(
                    x,
                    lambda u, s=s: w1_ref[s, u].astype(cdt),
                    lambda u, s=s: b1_ref[s, u].astype(cdt),
                    lambda u, s=s: w2_ref[s, u].astype(cdt),
                    b2_ref[s].astype(jnp.float32))
        else:
            def body(s, x):
                w1_s = w1_ref[s].astype(cdt)           # (U, Fp)
                b1_s = b1_ref[s].astype(cdt)
                w2_s = w2_ref[s].astype(cdt)
                b2_s = b2_ref[s].astype(jnp.float32)   # (Fp,)
                return residual_step(x, lambda u: w1_s[u], lambda u: b1_s[u],
                                     lambda u: w2_s[u], b2_s)
            x = lax.fori_loop(0, n_steps, body, x, unroll=step_unroll)
        return x

    if n_chunks == 1:
        o_ref[...] = run_steps(x_ref[...].astype(jnp.float32)).astype(o_ref.dtype)
    else:
        # Register-resident row chunks: one load + one store per element for
        # the whole S-step chain.
        @pl.loop(0, n_chunks)
        def _(c):
            r0 = pl.multiple_of(c * row_chunk, row_chunk)
            rows = pl.ds(r0, row_chunk)
            x = x_ref[rows, :].astype(jnp.float32)
            o_ref[rows, :] = run_steps(x).astype(o_ref.dtype)


def dist_transform_resnet(x, w1, b1, w2, b2, *, batch_tile=4096,
                          max_packed_lanes=1024, max_unroll_steps=32,
                          step_unroll=2, compute_dtype=jnp.float32):
    """x: (B, F). w1/b1/w2: (S, U, F). b2: (S, F). Returns (B, F)."""
    B, F = x.shape
    S, U, Fw = w1.shape
    assert Fw == F and b1.shape == (S, U, F)
    assert w2.shape == (S, U, F) and b2.shape == (S, F)

    itemsize = x.dtype.itemsize
    sub = max(8, 32 // itemsize)      # sublane multiple: 8 f32 / 16 bf16 / 32 i8

    # ---- lane-dense packing: fold k batch rows into the lane axis so the ----
    # ---- packed feature width Fp = k*F is a multiple of 128.              ----
    k = _LANE // math.gcd(F, _LANE)
    if k * F > max_packed_lanes:
        k = 1   # TODO(synk): pad the lane axis with zero-weight features instead.
    Fp = k * F

    n_rows = pl.cdiv(B, k)            # batch length in packed rows

    # ---- register-resident row chunk (~8 vregs of f32 x per chunk) ---------
    row_chunk = max(sub, min(256, ((8192 // max(Fp, 1)) // sub) * sub))

    # ---- VMEM accounting (conservative across v5e/v6e/v7x; v7x = 64 MiB) ---
    w_resident = 2 * (3 * S * U + S) * Fp * 4     # double-buffered f32 weights
    io_budget = max(40 * _MIB - w_resident, 4 * _MIB)
    max_tile_rows = max(sub, io_budget // (2 * 2 * Fp * itemsize))

    if n_rows < sub:
        bt = n_rows                   # tiny batch: single full-extent block
        row_chunk = bt
        rows_padded = n_rows
    else:
        bt = min(batch_tile, max_tile_rows, n_rows)
        if n_rows >= 2 * sub:
            # Guarantee >= 2 grid blocks so the "parallel" batch axis can shard
            # across both v7x TensorCores (harmless on single-TC v5e/v6e).
            bt = min(bt, pl.cdiv(n_rows, 2))
        bt = max(sub, (bt // sub) * sub)
        if bt >= row_chunk:
            bt = (bt // row_chunk) * row_chunk
        else:
            row_chunk = bt
        rows_padded = pl.cdiv(n_rows, bt) * bt
    n_chunks = bt // row_chunk

    pad_batch = rows_padded * k - B
    x_p = jnp.pad(x, ((0, pad_batch), (0, 0))) if pad_batch else x
    x_p = x_p.reshape(rows_padded, Fp)

    if k > 1:
        # Per-feature params replicate exactly under the (B,F)->(B/k, k*F) fold.
        w1_p = jnp.tile(w1, (1, 1, k))
        b1_p = jnp.tile(b1, (1, 1, k))
        w2_p = jnp.tile(w2, (1, 1, k))
        b2_p = jnp.tile(b2, (1, k))
    else:
        w1_p, b1_p, w2_p, b2_p = w1, b1, w2, b2

    kernel = functools.partial(
        _dist_transform_kernel, n_steps=S, n_units=U, row_chunk=row_chunk,
        n_chunks=n_chunks, max_unroll_steps=max_unroll_steps,
        step_unroll=step_unroll, compute_dtype=compute_dtype)

    # Exact footprint + headroom; never the full 64 MiB of a v7x TensorCore.
    io_bytes = 2 * 2 * bt * Fp * itemsize
    vmem_limit = int(min(max(io_bytes + w_resident + 8 * _MIB, 16 * _MIB),
                         56 * _MIB))

    cost = pl.CostEstimate(
        flops=int(B) * int(F) * int(S) * (5 * int(U) + 2),
        transcendentals=0,
        bytes_accessed=int(2 * B * F * itemsize + (3 * S * U + S) * F * 4))

    grid = (rows_padded // bt,)
    grid_spec = pltpu.PrefetchScalarGridSpec(
        num_scalar_prefetch=0,
        grid=grid,
        in_specs=[
            pl.BlockSpec((bt, Fp), lambda i: (i, 0)),
            # Grid-invariant weights: constant block index -> fetched once, the
            # pipeline skips re-DMA on subsequent grid steps.
            pl.BlockSpec((S, U, Fp), lambda i: (0, 0, 0)),
            pl.BlockSpec((S, U, Fp), lambda i: (0, 0, 0)),
            pl.BlockSpec((S, U, Fp), lambda i: (0, 0, 0)),
            pl.BlockSpec((S, Fp), lambda i: (0, 0)),
        ],
        out_specs=pl.BlockSpec((bt, Fp), lambda i: (i, 0)),
    )

    out_p = pl.pallas_call(
        kernel,
        out_shape=jax.ShapeDtypeStruct((rows_padded, Fp), x.dtype),
        grid_spec=grid_spec,
        # In-place residual update; XLA inserts a copy if x_p's buffer is still
        # live outside the call, so the caller's x is never clobbered.
        input_output_aliases={0: 0},
        cost_estimate=cost,
        compiler_params=pltpu.CompilerParams(
            dimension_semantics=("parallel",),
            vmem_limit_bytes=vmem_limit),
    )(x_p, w1_p, b1_p, w2_p, b2_p)

    out = out_p.reshape(rows_padded * k, F)
    return out[:B] if pad_batch else out


def init_params(key, n_steps, n_features, n_units, to_norm=0.9):
    """Deterministic synthetic params matching the PyTorch module shapes.

    Conv1: Conv2d(F, F*U, 1x1, groups=F)  -> per-feature weight (U, 1), bias (U,)
    Conv2: Conv2d(F*U, F, 1x1, groups=F)  -> per-feature weight (1, U), bias (1,)
    Spectral norm of each per-group matrix is its L2 norm (rank-1), rescaled to
    `to_norm` as conv_spectral_norm(..., to_norm=0.9) would produce.
    """
    keys = jax.random.split(key, 4)
    w1 = jax.random.normal(keys[0], (n_steps, n_units, n_features), jnp.float32)
    b1 = 0.1 * jax.random.normal(keys[1], (n_steps, n_units, n_features), jnp.float32)
    w2 = jax.random.normal(keys[2], (n_steps, n_units, n_features), jnp.float32)
    b2 = 0.1 * jax.random.normal(keys[3], (n_steps, n_features), jnp.float32)

    sn1 = jnp.sqrt(jnp.sum(w1 * w1, axis=1, keepdims=True)) + 1e-12
    sn2 = jnp.sqrt(jnp.sum(w2 * w2, axis=1, keepdims=True)) + 1e-12
    w1 = w1 / sn1 * to_norm
    w2 = w2 / sn2 * to_norm
    return w1, b1, w2, b2


def reference_forward(x, w1, b1, w2, b2):
    """Pure-JAX reference mirroring the PyTorch forward."""
    S, U, F = w1.shape
    for s in range(S):
        h = jnp.maximum(x[:, None, :] * w1[s][None] + b1[s][None], 0.0)  # (B,U,F)
        y = jnp.sum(w2[s][None] * h, axis=1) + b2[s][None]               # (B,F)
        x = x + y
    return x


if __name__ == "__main__":
    n_steps, n_features, n_units = 3, 8, 4
    key = jax.random.PRNGKey(0)
    kx, kp = jax.random.split(key)
    w1, b1, w2, b2 = init_params(kp, n_steps, n_features, n_units)

    # Case 1: batch not a multiple of the lane-packing factor (128/8 = 16):
    # exercises batch padding + a 2-block grid with a single in-kernel chunk.
    x1 = jax.random.normal(kx, (200, n_features), jnp.float32)
    out1 = jax.block_until_ready(dist_transform_resnet(x1, w1, b1, w2, b2))
    ref1 = reference_forward(x1, w1, b1, w2, b2)
    assert out1.shape == x1.shape
    assert jnp.allclose(out1, ref1, atol=1e-5, rtol=1e-5), "mismatch (case 1)"

    # Case 2: larger batch: exercises the register-resident row-chunk loop
    # (n_chunks > 1) and the >= 2-block parallel grid without padding.
    x2 = jax.random.normal(kx, (4096, n_features), jnp.float32)
    out2 = jax.block_until_ready(dist_transform_resnet(x2, w1, b1, w2, b2))
    ref2 = reference_forward(x2, w1, b1, w2, b2)
    assert jnp.allclose(out2, ref2, atol=1e-5, rtol=1e-5), "mismatch (case 2)"

    print("KERNEL_OK")
</pallas_src>

<mosaic_0001>
module attributes {stable_mosaic.version = 11 : i64} {
  func.func @_dist_transform_kernel(%arg0: i32, %arg1: memref<8x128xf32, #tpu.memory_space<vmem>>, %arg2: memref<3x4x128xf32, #tpu.memory_space<vmem>>, %arg3: memref<3x4x128xf32, #tpu.memory_space<vmem>>, %arg4: memref<3x4x128xf32, #tpu.memory_space<vmem>>, %arg5: memref<3x128xf32, #tpu.memory_space<vmem>>, %arg6: memref<8x128xf32, #tpu.memory_space<vmem>>) attributes {dimension_semantics = [#tpu.dimension_semantics<parallel>], iteration_bounds = array<i64: 2>, scalar_prefetch = 0 : i64, scratch_operands = 0 : i64, tpu.core_type = #tpu.core_type<tc>, window_params = [{transform_indices = @transform_0, window_bounds = array<i64: 8, 128>}, {pipeline_mode = #tpu.pipeline_mode<synchronous>, transform_indices = @transform_1, window_bounds = array<i64: 3, 4, 128>}, {pipeline_mode = #tpu.pipeline_mode<synchronous>, transform_indices = @transform_2, window_bounds = array<i64: 3, 4, 128>}, {pipeline_mode = #tpu.pipeline_mode<synchronous>, transform_indices = @transform_3, window_bounds = array<i64: 3, 4, 128>}, {pipeline_mode = #tpu.pipeline_mode<synchronous>, transform_indices = @transform_4, window_bounds = array<i64: 3, 128>}, {transform_indices = @transform_5, window_bounds = array<i64: 8, 128>}]} {
    %c0 = arith.constant 0 : index
    %c0_0 = arith.constant 0 : index
    %0 = vector.load %arg1[%c0, %c0_0] : memref<8x128xf32, #tpu.memory_space<vmem>>, vector<8x128xf32>
    %c0_1 = arith.constant 0 : index
    %c0_2 = arith.constant 0 : index
    %1 = vector.load %arg5[%c0_1, %c0_2] : memref<3x128xf32, #tpu.memory_space<vmem>>, vector<1x128xf32>
    %2 = vector.shape_cast %1 : vector<1x128xf32> to vector<128xf32>
    %c0_3 = arith.constant 0 : index
    %c0_4 = arith.constant 0 : index
    %c0_5 = arith.constant 0 : index
    %3 = vector.load %arg2[%c0_3, %c0_4, %c0_5] : memref<3x4x128xf32, #tpu.memory_space<vmem>>, vector<1x1x128xf32>
    %4 = vector.shape_cast %3 : vector<1x1x128xf32> to vector<128xf32>
    %5 = vector.shape_cast %4 : vector<128xf32> to vector<1x128xf32>
    %6 = vector.broadcast %5 : vector<1x128xf32> to vector<8x128xf32>
    %7 = arith.mulf %6, %0 : vector<8x128xf32>
    %c0_6 = arith.constant 0 : index
    %c0_7 = arith.constant 0 : index
    %c0_8 = arith.constant 0 : index
    %8 = vector.load %arg3[%c0_6, %c0_7, %c0_8] : memref<3x4x128xf32, #tpu.memory_space<vmem>>, vector<1x1x128xf32>
    %9 = vector.shape_cast %8 : vector<1x1x128xf32> to vector<128xf32>
    %10 = vector.shape_cast %9 : vector<128xf32> to vector<1x128xf32>
    %11 = vector.broadcast %10 : vector<1x128xf32> to vector<8x128xf32>
    %12 = arith.addf %7, %11 : vector<8x128xf32>
    %cst = arith.constant 0.000000e+00 : f32
    %13 = vector.broadcast %cst : f32 to vector<8x128xf32>
    %14 = arith.maximumf %12, %13 : vector<8x128xf32>
    %c0_9 = arith.constant 0 : index
    %c0_10 = arith.constant 0 : index
    %c0_11 = arith.constant 0 : index
    %15 = vector.load %arg4[%c0_9, %c0_10, %c0_11] : memref<3x4x128xf32, #tpu.memory_space<vmem>>, vector<1x1x128xf32>
    %16 = vector.shape_cast %15 : vector<1x1x128xf32> to vector<128xf32>
    %17 = vector.shape_cast %16 : vector<128xf32> to vector<1x128xf32>
    %18 = vector.broadcast %17 : vector<1x128xf32> to vector<8x128xf32>
    %19 = arith.mulf %18, %14 : vector<8x128xf32>
    %c0_12 = arith.constant 0 : index
    %c1 = arith.constant 1 : index
    %c0_13 = arith.constant 0 : index
    %20 = vector.load %arg2[%c0_12, %c1, %c0_13] : memref<3x4x128xf32, #tpu.memory_space<vmem>>, vector<1x1x128xf32>
    %21 = vector.shape_cast %20 : vector<1x1x128xf32> to vector<128xf32>
    %22 = vector.shape_cast %21 : vector<128xf32> to vector<1x128xf32>
    %23 = vector.broadcast %22 : vector<1x128xf32> to vector<8x128xf32>
    %24 = arith.mulf %23, %0 : vector<8x128xf32>
    %c0_14 = arith.constant 0 : index
    %c1_15 = arith.constant 1 : index
    %c0_16 = arith.constant 0 : index
    %25 = vector.load %arg3[%c0_14, %c1_15, %c0_16] : memref<3x4x128xf32, #tpu.memory_space<vmem>>, vector<1x1x128xf32>
    %26 = vector.shape_cast %25 : vector<1x1x128xf32> to vector<128xf32>
    %27 = vector.shape_cast %26 : vector<128xf32> to vector<1x128xf32>
    %28 = vector.broadcast %27 : vector<1x128xf32> to vector<8x128xf32>
    %29 = arith.addf %24, %28 : vector<8x128xf32>
    %cst_17 = arith.constant 0.000000e+00 : f32
    %30 = vector.broadcast %cst_17 : f32 to vector<8x128xf32>
    %31 = arith.maximumf %29, %30 : vector<8x128xf32>
    %c0_18 = arith.constant 0 : index
    %c1_19 = arith.constant 1 : index
    %c0_20 = arith.constant 0 : index
    %32 = vector.load %arg4[%c0_18, %c1_19, %c0_20] : memref<3x4x128xf32, #tpu.memory_space<vmem>>, vector<1x1x128xf32>
    %33 = vector.shape_cast %32 : vector<1x1x128xf32> to vector<128xf32>
    %34 = vector.shape_cast %33 : vector<128xf32> to vector<1x128xf32>
    %35 = vector.broadcast %34 : vector<1x128xf32> to vector<8x128xf32>
    %36 = arith.mulf %35, %31 : vector<8x128xf32>
    %37 = arith.addf %19, %36 : vector<8x128xf32>
    %c0_21 = arith.constant 0 : index
    %c2 = arith.constant 2 : index
    %c0_22 = arith.constant 0 : index
    %38 = vector.load %arg2[%c0_21, %c2, %c0_22] : memref<3x4x128xf32, #tpu.memory_space<vmem>>, vector<1x1x128xf32>
    %39 = vector.shape_cast %38 : vector<1x1x128xf32> to vector<128xf32>
    %40 = vector.shape_cast %39 : vector<128xf32> to vector<1x128xf32>
    %41 = vector.broadcast %40 : vector<1x128xf32> to vector<8x128xf32>
    %42 = arith.mulf %41, %0 : vector<8x128xf32>
    %c0_23 = arith.constant 0 : index
    %c2_24 = arith.constant 2 : index
    %c0_25 = arith.constant 0 : index
    %43 = vector.load %arg3[%c0_23, %c2_24, %c0_25] : memref<3x4x128xf32, #tpu.memory_space<vmem>>, vector<1x1x128xf32>
    %44 = vector.shape_cast %43 : vector<1x1x128xf32> to vector<128xf32>
    %45 = vector.shape_cast %44 : vector<128xf32> to vector<1x128xf32>
    %46 = vector.broadcast %45 : vector<1x128xf32> to vector<8x128xf32>
    %47 = arith.addf %42, %46 : vector<8x128xf32>
    %cst_26 = arith.constant 0.000000e+00 : f32
    %48 = vector.broadcast %cst_26 : f32 to vector<8x128xf32>
    %49 = arith.maximumf %47, %48 : vector<8x128xf32>
    %c0_27 = arith.constant 0 : index
    %c2_28 = arith.constant 2 : index
    %c0_29 = arith.constant 0 : index
    %50 = vector.load %arg4[%c0_27, %c2_28, %c0_29] : memref<3x4x128xf32, #tpu.memory_space<vmem>>, vector<1x1x128xf32>
    %51 = vector.shape_cast %50 : vector<1x1x128xf32> to vector<128xf32>
    %52 = vector.shape_cast %51 : vector<128xf32> to vector<1x128xf32>
    %53 = vector.broadcast %52 : vector<1x128xf32> to vector<8x128xf32>
    %54 = arith.mulf %53, %49 : vector<8x128xf32>
    %55 = arith.addf %37, %54 : vector<8x128xf32>
    %c0_30 = arith.constant 0 : index
    %c3 = arith.constant 3 : index
    %c0_31 = arith.constant 0 : index
    %56 = vector.load %arg2[%c0_30, %c3, %c0_31] : memref<3x4x128xf32, #tpu.memory_space<vmem>>, vector<1x1x128xf32>
    %57 = vector.shape_cast %56 : vector<1x1x128xf32> to vector<128xf32>
    %58 = vector.shape_cast %57 : vector<128xf32> to vector<1x128xf32>
    %59 = vector.broadcast %58 : vector<1x128xf32> to vector<8x128xf32>
    %60 = arith.mulf %59, %0 : vector<8x128xf32>
    %c0_32 = arith.constant 0 : index
    %c3_33 = arith.constant 3 : index
    %c0_34 = arith.constant 0 : index
    %61 = vector.load %arg3[%c0_32, %c3_33, %c0_34] : memref<3x4x128xf32, #tpu.memory_space<vmem>>, vector<1x1x128xf32>
    %62 = vector.shape_cast %61 : vector<1x1x128xf32> to vector<128xf32>
    %63 = vector.shape_cast %62 : vector<128xf32> to vector<1x128xf32>
    %64 = vector.broadcast %63 : vector<1x128xf32> to vector<8x128xf32>
    %65 = arith.addf %60, %64 : vector<8x128xf32>
    %cst_35 = arith.constant 0.000000e+00 : f32
    %66 = vector.broadcast %cst_35 : f32 to vector<8x128xf32>
    %67 = arith.maximumf %65, %66 : vector<8x128xf32>
    %c0_36 = arith.constant 0 : index
    %c3_37 = arith.constant 3 : index
    %c0_38 = arith.constant 0 : index
    %68 = vector.load %arg4[%c0_36, %c3_37, %c0_38] : memref<3x4x128xf32, #tpu.memory_space<vmem>>, vector<1x1x128xf32>
    %69 = vector.shape_cast %68 : vector<1x1x128xf32> to vector<128xf32>
    %70 = vector.shape_cast %69 : vector<128xf32> to vector<1x128xf32>
    %71 = vector.broadcast %70 : vector<1x128xf32> to vector<8x128xf32>
    %72 = arith.mulf %71, %67 : vector<8x128xf32>
    %73 = arith.addf %55, %72 : vector<8x128xf32>
    %74 = vector.shape_cast %2 : vector<128xf32> to vector<1x128xf32>
    %75 = vector.broadcast %74 : vector<1x128xf32> to vector<8x128xf32>
    %76 = arith.addf %73, %75 : vector<8x128xf32>
    %77 = arith.addf %0, %76 : vector<8x128xf32>
    %c1_39 = arith.constant 1 : index
    %c0_40 = arith.constant 0 : index
    %78 = vector.load %arg5[%c1_39, %c0_40] : memref<3x128xf32, #tpu.memory_space<vmem>>, vector<1x128xf32>
    %79 = vector.shape_cast %78 : vector<1x128xf32> to vector<128xf32>
    %c1_41 = arith.constant 1 : index
    %c0_42 = arith.constant 0 : index
    %c0_43 = arith.constant 0 : index
    %80 = vector.load %arg2[%c1_41, %c0_42, %c0_43] : memref<3x4x128xf32, #tpu.memory_space<vmem>>, vector<1x1x128xf32>
    %81 = vector.shape_cast %80 : vector<1x1x128xf32> to vector<128xf32>
    %82 = vector.shape_cast %81 : vector<128xf32> to vector<1x128xf32>
    %83 = vector.broadcast %82 : vector<1x128xf32> to vector<8x128xf32>
    %84 = arith.mulf %83, %77 : vector<8x128xf32>
    %c1_44 = arith.constant 1 : index
    %c0_45 = arith.constant 0 : index
    %c0_46 = arith.constant 0 : index
    %85 = vector.load %arg3[%c1_44, %c0_45, %c0_46] : memref<3x4x128xf32, #tpu.memory_space<vmem>>, vector<1x1x128xf32>
    %86 = vector.shape_cast %85 : vector<1x1x128xf32> to vector<128xf32>
    %87 = vector.shape_cast %86 : vector<128xf32> to vector<1x128xf32>
    %88 = vector.broadcast %87 : vector<1x128xf32> to vector<8x128xf32>
    %89 = arith.addf %84, %88 : vector<8x128xf32>
    %cst_47 = arith.constant 0.000000e+00 : f32
    %90 = vector.broadcast %cst_47 : f32 to vector<8x128xf32>
    %91 = arith.maximumf %89, %90 : vector<8x128xf32>
    %c1_48 = arith.constant 1 : index
    %c0_49 = arith.constant 0 : index
    %c0_50 = arith.constant 0 : index
    %92 = vector.load %arg4[%c1_48, %c0_49, %c0_50] : memref<3x4x128xf32, #tpu.memory_space<vmem>>, vector<1x1x128xf32>
    %93 = vector.shape_cast %92 : vector<1x1x128xf32> to vector<128xf32>
    %94 = vector.shape_cast %93 : vector<128xf32> to vector<1x128xf32>
    %95 = vector.broadcast %94 : vector<1x128xf32> to vector<8x128xf32>
    %96 = arith.mulf %95, %91 : vector<8x128xf32>
    %c1_51 = arith.constant 1 : index
    %c1_52 = arith.constant 1 : index
    %c0_53 = arith.constant 0 : index
    %97 = vector.load %arg2[%c1_51, %c1_52, %c0_53] : memref<3x4x128xf32, #tpu.memory_space<vmem>>, vector<1x1x128xf32>
    %98 = vector.shape_cast %97 : vector<1x1x128xf32> to vector<128xf32>
    %99 = vector.shape_cast %98 : vector<128xf32> to vector<1x128xf32>
    %100 = vector.broadcast %99 : vector<1x128xf32> to vector<8x128xf32>
    %101 = arith.mulf %100, %77 : vector<8x128xf32>
    %c1_54 = arith.constant 1 : index
    %c1_55 = arith.constant 1 : index
    %c0_56 = arith.constant 0 : index
    %102 = vector.load %arg3[%c1_54, %c1_55, %c0_56] : memref<3x4x128xf32, #tpu.memory_space<vmem>>, vector<1x1x128xf32>
    %103 = vector.shape_cast %102 : vector<1x1x128xf32> to vector<128xf32>
    %104 = vector.shape_cast %103 : vector<128xf32> to vector<1x128xf32>
    %105 = vector.broadcast %104 : vector<1x128xf32> to vector<8x128xf32>
    %106 = arith.addf %101, %105 : vector<8x128xf32>
    %cst_57 = arith.constant 0.000000e+00 : f32
    %107 = vector.broadcast %cst_57 : f32 to vector<8x128xf32>
    %108 = arith.maximumf %106, %107 : vector<8x128xf32>
    %c1_58 = arith.constant 1 : index
    %c1_59 = arith.constant 1 : index
    %c0_60 = arith.constant 0 : index
    %109 = vector.load %arg4[%c1_58, %c1_59, %c0_60] : memref<3x4x128xf32, #tpu.memory_space<vmem>>, vector<1x1x128xf32>
    %110 = vector.shape_cast %109 : vector<1x1x128xf32> to vector<128xf32>
    %111 = vector.shape_cast %110 : vector<128xf32> to vector<1x128xf32>
    %112 = vector.broadcast %111 : vector<1x128xf32> to vector<8x128xf32>
    %113 = arith.mulf %112, %108 : vector<8x128xf32>
    %114 = arith.addf %96, %113 : vector<8x128xf32>
    %c1_61 = arith.constant 1 : index
    %c2_62 = arith.constant 2 : index
    %c0_63 = arith.constant 0 : index
    %115 = vector.load %arg2[%c1_61, %c2_62, %c0_63] : memref<3x4x128xf32, #tpu.memory_space<vmem>>, vector<1x1x128xf32>
    %116 = vector.shape_cast %115 : vector<1x1x128xf32> to vector<128xf32>
    %117 = vector.shape_cast %116 : vector<128xf32> to vector<1x128xf32>
    %118 = vector.broadcast %117 : vector<1x128xf32> to vector<8x128xf32>
    %119 = arith.mulf %118, %77 : vector<8x128xf32>
    %c1_64 = arith.constant 1 : index
    %c2_65 = arith.constant 2 : index
    %c0_66 = arith.constant 0 : index
    %120 = vector.load %arg3[%c1_64, %c2_65, %c0_66] : memref<3x4x128xf32, #tpu.memory_space<vmem>>, vector<1x1x128xf32>
    %121 = vector.shape_cast %120 : vector<1x1x128xf32> to vector<128xf32>
    %122 = vector.shape_cast %121 : vector<128xf32> to vector<1x128xf32>
    %123 = vector.broadcast %122 : vector<1x128xf32> to vector<8x128xf32>
    %124 = arith.addf %119, %123 : vector<8x128xf32>
    %cst_67 = arith.constant 0.000000e+00 : f32
    %125 = vector.broadcast %cst_67 : f32 to vector<8x128xf32>
    %126 = arith.maximumf %124, %125 : vector<8x128xf32>
    %c1_68 = arith.constant 1 : index
    %c2_69 = arith.constant 2 : index
    %c0_70 = arith.constant 0 : index
    %127 = vector.load %arg4[%c1_68, %c2_69, %c0_70] : memref<3x4x128xf32, #tpu.memory_space<vmem>>, vector<1x1x128xf32>
    %128 = vector.shape_cast %127 : vector<1x1x128xf32> to vector<128xf32>
    %129 = vector.shape_cast %128 : vector<128xf32> to vector<1x128xf32>
    %130 = vector.broadcast %129 : vector<1x128xf32> to vector<8x128xf32>
    %131 = arith.mulf %130, %126 : vector<8x128xf32>
    %132 = arith.addf %114, %131 : vector<8x128xf32>
    %c1_71 = arith.constant 1 : index
    %c3_72 = arith.constant 3 : index
    %c0_73 = arith.constant 0 : index
    %133 = vector.load %arg2[%c1_71, %c3_72, %c0_73] : memref<3x4x128xf32, #tpu.memory_space<vmem>>, vector<1x1x128xf32>
    %134 = vector.shape_cast %133 : vector<1x1x128xf32> to vector<128xf32>
    %135 = vector.shape_cast %134 : vector<128xf32> to vector<1x128xf32>
    %136 = vector.broadcast %135 : vector<1x128xf32> to vector<8x128xf32>
    %137 = arith.mulf %136, %77 : vector<8x128xf32>
    %c1_74 = arith.constant 1 : index
    %c3_75 = arith.constant 3 : index
    %c0_76 = arith.constant 0 : index
    %138 = vector.load %arg3[%c1_74, %c3_75, %c0_76] : memref<3x4x128xf32, #tpu.memory_space<vmem>>, vector<1x1x128xf32>
    %139 = vector.shape_cast %138 : vector<1x1x128xf32> to vector<128xf32>
    %140 = vector.shape_cast %139 : vector<128xf32> to vector<1x128xf32>
    %141 = vector.broadcast %140 : vector<1x128xf32> to vector<8x128xf32>
    %142 = arith.addf %137, %141 : vector<8x128xf32>
    %cst_77 = arith.constant 0.000000e+00 : f32
    %143 = vector.broadcast %cst_77 : f32 to vector<8x128xf32>
    %144 = arith.maximumf %142, %143 : vector<8x128xf32>
    %c1_78 = arith.constant 1 : index
    %c3_79 = arith.constant 3 : index
    %c0_80 = arith.constant 0 : index
    %145 = vector.load %arg4[%c1_78, %c3_79, %c0_80] : memref<3x4x128xf32, #tpu.memory_space<vmem>>, vector<1x1x128xf32>
    %146 = vector.shape_cast %145 : vector<1x1x128xf32> to vector<128xf32>
    %147 = vector.shape_cast %146 : vector<128xf32> to vector<1x128xf32>
    %148 = vector.broadcast %147 : vector<1x128xf32> to vector<8x128xf32>
    %149 = arith.mulf %148, %144 : vector<8x128xf32>
    %150 = arith.addf %132, %149 : vector<8x128xf32>
    %151 = vector.shape_cast %79 : vector<128xf32> to vector<1x128xf32>
    %152 = vector.broadcast %151 : vector<1x128xf32> to vector<8x128xf32>
    %153 = arith.addf %150, %152 : vector<8x128xf32>
    %154 = arith.addf %77, %153 : vector<8x128xf32>
    %c2_81 = arith.constant 2 : index
    %c0_82 = arith.constant 0 : index
    %155 = vector.load %arg5[%c2_81, %c0_82] : memref<3x128xf32, #tpu.memory_space<vmem>>, vector<1x128xf32>
    %156 = vector.shape_cast %155 : vector<1x128xf32> to vector<128xf32>
    %c2_83 = arith.constant 2 : index
    %c0_84 = arith.constant 0 : index
    %c0_85 = arith.constant 0 : index
    %157 = vector.load %arg2[%c2_83, %c0_84, %c0_85] : memref<3x4x128xf32, #tpu.memory_space<vmem>>, vector<1x1x128xf32>
    %158 = vector.shape_cast %157 : vector<1x1x128xf32> to vector<128xf32>
    %159 = vector.shape_cast %158 : vector<128xf32> to vector<1x128xf32>
    %160 = vector.broadcast %159 : vector<1x128xf32> to vector<8x128xf32>
    %161 = arith.mulf %160, %154 : vector<8x128xf32>
    %c2_86 = arith.constant 2 : index
    %c0_87 = arith.constant 0 : index
    %c0_88 = arith.constant 0 : index
    %162 = vector.load %arg3[%c2_86, %c0_87, %c0_88] : memref<3x4x128xf32, #tpu.memory_space<vmem>>, vector<1x1x128xf32>
    %163 = vector.shape_cast %162 : vector<1x1x128xf32> to vector<128xf32>
    %164 = vector.shape_cast %163 : vector<128xf32> to vector<1x128xf32>
    %165 = vector.broadcast %164 : vector<1x128xf32> to vector<8x128xf32>
    %166 = arith.addf %161, %165 : vector<8x128xf32>
    %cst_89 = arith.constant 0.000000e+00 : f32
    %167 = vector.broadcast %cst_89 : f32 to vector<8x128xf32>
    %168 = arith.maximumf %166, %167 : vector<8x128xf32>
    %c2_90 = arith.constant 2 : index
    %c0_91 = arith.constant 0 : index
    %c0_92 = arith.constant 0 : index
    %169 = vector.load %arg4[%c2_90, %c0_91, %c0_92] : memref<3x4x128xf32, #tpu.memory_space<vmem>>, vector<1x1x128xf32>
    %170 = vector.shape_cast %169 : vector<1x1x128xf32> to vector<128xf32>
    %171 = vector.shape_cast %170 : vector<128xf32> to vector<1x128xf32>
    %172 = vector.broadcast %171 : vector<1x128xf32> to vector<8x128xf32>
    %173 = arith.mulf %172, %168 : vector<8x128xf32>
    %c2_93 = arith.constant 2 : index
    %c1_94 = arith.constant 1 : index
    %c0_95 = arith.constant 0 : index
    %174 = vector.load %arg2[%c2_93, %c1_94, %c0_95] : memref<3x4x128xf32, #tpu.memory_space<vmem>>, vector<1x1x128xf32>
    %175 = vector.shape_cast %174 : vector<1x1x128xf32> to vector<128xf32>
    %176 = vector.shape_cast %175 : vector<128xf32> to vector<1x128xf32>
    %177 = vector.broadcast %176 : vector<1x128xf32> to vector<8x128xf32>
    %178 = arith.mulf %177, %154 : vector<8x128xf32>
    %c2_96 = arith.constant 2 : index
    %c1_97 = arith.constant 1 : index
    %c0_98 = arith.constant 0 : index
    %179 = vector.load %arg3[%c2_96, %c1_97, %c0_98] : memref<3x4x128xf32, #tpu.memory_space<vmem>>, vector<1x1x128xf32>
    %180 = vector.shape_cast %179 : vector<1x1x128xf32> to vector<128xf32>
    %181 = vector.shape_cast %180 : vector<128xf32> to vector<1x128xf32>
    %182 = vector.broadcast %181 : vector<1x128xf32> to vector<8x128xf32>
    %183 = arith.addf %178, %182 : vector<8x128xf32>
    %cst_99 = arith.constant 0.000000e+00 : f32
    %184 = vector.broadcast %cst_99 : f32 to vector<8x128xf32>
    %185 = arith.maximumf %183, %184 : vector<8x128xf32>
    %c2_100 = arith.constant 2 : index
    %c1_101 = arith.constant 1 : index
    %c0_102 = arith.constant 0 : index
    %186 = vector.load %arg4[%c2_100, %c1_101, %c0_102] : memref<3x4x128xf32, #tpu.memory_space<vmem>>, vector<1x1x128xf32>
    %187 = vector.shape_cast %186 : vector<1x1x128xf32> to vector<128xf32>
    %188 = vector.shape_cast %187 : vector<128xf32> to vector<1x128xf32>
    %189 = vector.broadcast %188 : vector<1x128xf32> to vector<8x128xf32>
    %190 = arith.mulf %189, %185 : vector<8x128xf32>
    %191 = arith.addf %173, %190 : vector<8x128xf32>
    %c2_103 = arith.constant 2 : index
    %c2_104 = arith.constant 2 : index
    %c0_105 = arith.constant 0 : index
    %192 = vector.load %arg2[%c2_103, %c2_104, %c0_105] : memref<3x4x128xf32, #tpu.memory_space<vmem>>, vector<1x1x128xf32>
    %193 = vector.shape_cast %192 : vector<1x1x128xf32> to vector<128xf32>
    %194 = vector.shape_cast %193 : vector<128xf32> to vector<1x128xf32>
    %195 = vector.broadcast %194 : vector<1x128xf32> to vector<8x128xf32>
    %196 = arith.mulf %195, %154 : vector<8x128xf32>
    %c2_106 = arith.constant 2 : index
    %c2_107 = arith.constant 2 : index
    %c0_108 = arith.constant 0 : index
    %197 = vector.load %arg3[%c2_106, %c2_107, %c0_108] : memref<3x4x128xf32, #tpu.memory_space<vmem>>, vector<1x1x128xf32>
    %198 = vector.shape_cast %197 : vector<1x1x128xf32> to vector<128xf32>
    %199 = vector.shape_cast %198 : vector<128xf32> to vector<1x128xf32>
    %200 = vector.broadcast %199 : vector<1x128xf32> to vector<8x128xf32>
    %201 = arith.addf %196, %200 : vector<8x128xf32>
    %cst_109 = arith.constant 0.000000e+00 : f32
    %202 = vector.broadcast %cst_109 : f32 to vector<8x128xf32>
    %203 = arith.maximumf %201, %202 : vector<8x128xf32>
    %c2_110 = arith.constant 2 : index
    %c2_111 = arith.constant 2 : index
    %c0_112 = arith.constant 0 : index
    %204 = vector.load %arg4[%c2_110, %c2_111, %c0_112] : memref<3x4x128xf32, #tpu.memory_space<vmem>>, vector<1x1x128xf32>
    %205 = vector.shape_cast %204 : vector<1x1x128xf32> to vector<128xf32>
    %206 = vector.shape_cast %205 : vector<128xf32> to vector<1x128xf32>
    %207 = vector.broadcast %206 : vector<1x128xf32> to vector<8x128xf32>
    %208 = arith.mulf %207, %203 : vector<8x128xf32>
    %209 = arith.addf %191, %208 : vector<8x128xf32>
    %c2_113 = arith.constant 2 : index
    %c3_114 = arith.constant 3 : index
    %c0_115 = arith.constant 0 : index
    %210 = vector.load %arg2[%c2_113, %c3_114, %c0_115] : memref<3x4x128xf32, #tpu.memory_space<vmem>>, vector<1x1x128xf32>
    %211 = vector.shape_cast %210 : vector<1x1x128xf32> to vector<128xf32>
    %212 = vector.shape_cast %211 : vector<128xf32> to vector<1x128xf32>
    %213 = vector.broadcast %212 : vector<1x128xf32> to vector<8x128xf32>
    %214 = arith.mulf %213, %154 : vector<8x128xf32>
    %c2_116 = arith.constant 2 : index
    %c3_117 = arith.constant 3 : index
    %c0_118 = arith.constant 0 : index
    %215 = vector.load %arg3[%c2_116, %c3_117, %c0_118] : memref<3x4x128xf32, #tpu.memory_space<vmem>>, vector<1x1x128xf32>
    %216 = vector.shape_cast %215 : vector<1x1x128xf32> to vector<128xf32>
    %217 = vector.shape_cast %216 : vector<128xf32> to vector<1x128xf32>
    %218 = vector.broadcast %217 : vector<1x128xf32> to vector<8x128xf32>
    %219 = arith.addf %214, %218 : vector<8x128xf32>
    %cst_119 = arith.constant 0.000000e+00 : f32
    %220 = vector.broadcast %cst_119 : f32 to vector<8x128xf32>
    %221 = arith.maximumf %219, %220 : vector<8x128xf32>
    %c2_120 = arith.constant 2 : index
    %c3_121 = arith.constant 3 : index
    %c0_122 = arith.constant 0 : index
    %222 = vector.load %arg4[%c2_120, %c3_121, %c0_122] : memref<3x4x128xf32, #tpu.memory_space<vmem>>, vector<1x1x128xf32>
    %223 = vector.shape_cast %222 : vector<1x1x128xf32> to vector<128xf32>
    %224 = vector.shape_cast %223 : vector<128xf32> to vector<1x128xf32>
    %225 = vector.broadcast %224 : vector<1x128xf32> to vector<8x128xf32>
    %226 = arith.mulf %225, %221 : vector<8x128xf32>
    %227 = arith.addf %209, %226 : vector<8x128xf32>
    %228 = vector.shape_cast %156 : vector<128xf32> to vector<1x128xf32>
    %229 = vector.broadcast %228 : vector<1x128xf32> to vector<8x128xf32>
    %230 = arith.addf %227, %229 : vector<8x128xf32>
    %231 = arith.addf %154, %230 : vector<8x128xf32>
    %c0_123 = arith.constant 0 : index
    %c0_124 = arith.constant 0 : index
    %232 = vector.load %arg6[%c0_123, %c0_124] : memref<8x128xf32, #tpu.memory_space<vmem>>, vector<8x128xf32>
    tpu.vector_store %arg6[%c0_123, %c0_124], %231 {strides = array<i32>} : memref<8x128xf32, #tpu.memory_space<vmem>>, vector<8x128xf32>,
    return
  }
  func.func @transform_0(%arg0: i32) -> (i32, i32) {
    %c0_i32 = arith.constant 0 : i32
    %c0_i32_0 = arith.constant 0 : i32
    return %arg0, %c0_i32 : i32, i32
  }
  func.func @transform_1(%arg0: i32) -> (i32, i32, i32) {
    %c0_i32 = arith.constant 0 : i32
    %c0_i32_0 = arith.constant 0 : i32
    %c0_i32_1 = arith.constant 0 : i32
    %c0_i32_2 = arith.constant 0 : i32
    return %c0_i32, %c0_i32_0, %c0_i32_1 : i32, i32, i32
  }
  func.func @transform_2(%arg0: i32) -> (i32, i32, i32) {
    %c0_i32 = arith.constant 0 : i32
    %c0_i32_0 = arith.constant 0 : i32
    %c0_i32_1 = arith.constant 0 : i32
    %c0_i32_2 = arith.constant 0 : i32
    return %c0_i32, %c0_i32_0, %c0_i32_1 : i32, i32, i32
  }
  func.func @transform_3(%arg0: i32) -> (i32, i32, i32) {
    %c0_i32 = arith.constant 0 : i32
    %c0_i32_0 = arith.constant 0 : i32
    %c0_i32_1 = arith.constant 0 : i32
    %c0_i32_2 = arith.constant 0 : i32
    return %c0_i32, %c0_i32_0, %c0_i32_1 : i32, i32, i32
  }
  func.func @transform_4(%arg0: i32) -> (i32, i32) {
    %c0_i32 = arith.constant 0 : i32
    %c0_i32_0 = arith.constant 0 : i32
    %c0_i32_1 = arith.constant 0 : i32
    return %c0_i32, %c0_i32_0 : i32, i32
  }
  func.func @transform_5(%arg0: i32) -> (i32, i32) {
    %c0_i32 = arith.constant 0 : i32
    %c0_i32_0 = arith.constant 0 : i32
    return %arg0, %c0_i32 : i32, i32
  }
}

</mosaic_0001>

<bundles_post_ra>
// kernel: tpu_custom_call.1
= control target key start
LH: loop header
LB: loop body
LE: loop exit
PB: predicated region body
PF: predicated region fallthrough
CT: control target
= control target key end

     0   :  { %10 = vsyncpa [#allocation3], 0  ;;  %s1123_s0 = inlined_call_operand.hbm [shape: f32[16,128], index: 0, kind: input, shape index: {}, may-alias: {0,5}]   ;;  %s1124_s1 = inlined_call_operand.vmem [shape: f32[3,4,128], index: 1, kind: input, shape index: {}]   ;;  %s1125_s2 = inlined_call_operand.vmem [shape: f32[3,4,128], index: 2, kind: input, shape index: {}]   ;;  %s1126_s3 = inlined_call_operand.vmem [shape: f32[3,4,128], index: 3, kind: input, shape index: {}]   ;;  %s1127_s4 = inlined_call_operand.vmem [shape: f32[3,128], index: 4, kind: input, shape index: {}]   ;;  %s1128_s5 = inlined_call_operand.hbm [shape: f32[16,128], index: 5, kind: output, shape index: {}, may-alias: {0,5}]  }
   0x1   :  { %12 = vsyncpa [#allocation3 + $0x1], 0 }
   0x2   :  { %13 = vsyncpa [#allocation4], 0 }
   0x3   :  { %15 = vsyncpa [#allocation4 + $0x1], 0  ;;  %s841_s18 = smov 0   ;;  %s843_s19 = smov 0  }
   0x4   :  { %s845_s20 = smov 0   ;;  %s847_s21 = smov 0  }
   0x5 LB: > { %s862_s22 = sadd.s32 4294967295, %s807_s21   ;;  %s590_s23 = sadd.s32 4294967294, %s807_s21   ;;  %s807_s21 = sphi %s847_s21, %s1143_s21   ;;  %s803_s20 = sphi %s845_s20, %s1142_s20   ;;  %s799_s19 = sphi %s843_s19, %s1141_s19   ;;  %s795_s18 = sphi %s841_s18, %s1140_s18  }
   0x6   : > { %s866_s24 = sadd.s32 1, %s807_s21   ;;  %s28_s25 = sadd.s32 1, %s803_s20 }
   0x7   : > { %s25_s26 = ssub.s32 %s807_s21, %s866_s24  ;;  %p35_p0 = scmp.ne.s32.totalorder %s803_s20, %s799_s19 }
   0x8   : > { %p26_p1 = scmp.eq.s32.totalorder %s25_s26, 0  ;;  %p36_p2 = scmp.eq.s32.totalorder %s807_s21, 0 }
   0x9   : > { %p41_p3 = scmp.ne.s32.totalorder %s799_s19, %s795_s18  ;;  %p42_p4 = scmp.eq.s32.totalorder %s862_s22, 0 }
   0xa   : > { %s878_s27 = scalar_select %p26_p1, %s803_s20, %s28_s25  }
   0xb   : > { %p880_p5 = por %p36_p2, %p35_p0  ;;  %p884_p6 = por %p42_p4, %p41_p3 }
   0xc   : > { %p149_p7 = scmp.eq.s32.totalorder %s862_s22, 1  ;;  %p155_p8 = scmp.eq.s32.totalorder %s590_s23, 1 }
   0xd   : > { %p677_p10 = scmp.lt.s32.totalorder %s807_s21, 2  ;;  %s187_s7 = sand.u32 1, %s803_s20  }
   0xe   : > { %p891_p11 = por %p149_p7, %p35_p0  ;;  %p895_p12 = por %p155_p8, %p41_p3 }
   0xf   : > { %s594_s8 = sshll.u32 %s807_s21, 7  ;;  %s593_s9 = sshll.u32 %s187_s7, 3 }
  0x10   : > { %s1132_s30 = scalar_select %p891_p11, 1, 0 }
  0x11   : > { %s1133_s6 = scalar_select %p895_p12, 1, 0 }
  0x12   : > { %s904_s12 = scalar_lea.hbm %s1123_s0, %s594_s8  ;;  %s191_s13 = scalar_lea.vmem [#allocation2], %s593_s9 }
  0x13   : > { %s198_s14 = sshll.u32 %s191_s13, 4  ;;  %p908_p13 = pnand %p677_p10, %p880_p5  ;;  %s912_s14 = int_to_ptr.vmem [resolvable:$true] %s198_s14 }
  0x14   : > { %s188_s16 = scalar_lea.sflag [#allocation3], %s187_s7  ;;  %s711_s17 = scalar_lea.hbm %s904_s12, 128 }
  0x15   : > { %p712_p2 = scmp.ne.s32.totalorder %s904_s12, %s711_s17  ;;  %p713_p3 = pneg %p908_p13 }
  0x16   : > { %s716_s26 = scalar_lea.hbm %s1123_s0, 256  ;;  %p717_p5 = scmp.lt.u32.totalorder %s904_s12, %s1123_s0 }
  0x17   : > { %p714_p4 = pnand %p713_p3, %p712_p2  ;;  %p718_p8 = scmp.lt.u32.totalorder %s716_s26, %s711_s17 }
  0x18   : > { %p720_p9 = scmp.lt.u32.totalorder %s711_s17, %s904_s12 }
  0x19   : > { %p715_p7 = pneg %p714_p4  ;;  %p719_p10 = por %p718_p8, %p717_p5 }
  0x1b   : > { %p721_p0 = por %p720_p9, %p719_p10 }
  0x1d   : > { %p722_p1 = pnand %p721_p0, %p715_p7 }
  0x1f   : > { %725 = shalt.err (!%p722_p1)
}
  0x20   : > { %s726_s7 = scalar_lea.vmem %s912_s14, 128  ;;  %s809_s9 = smov [#allocation2]  }
  0x21   : > { %p727_p2 = scmp.ne.s32.totalorder %s912_s14, %s726_s7  ;;  %s731_s10 = sshll.u32 %s809_s9, 4  ;;  %s732_s10 = int_to_ptr.vmem [resolvable:$false] %s731_s10 }
  0x22   : > { %s733_s11 = scalar_lea.vmem %s732_s10, 256  ;;  %p734_p11 = scmp.lt.s32.totalorder %s912_s14, %s732_s10 }
  0x23   : > { %p729_p4 = pnand %p727_p2, %p713_p3  ;;  %p735_p5 = scmp.lt.s32.totalorder %s733_s11, %s726_s7 }
  0x25   : > { %p730_p12 = pneg %p729_p4  ;;  %p736_p8 = por %p735_p5, %p734_p11 }
  0x27   : > { %p737_p9 = pnand %p736_p8, %p730_p12 }
  0x29   : > { %740 = shalt.err (!%p737_p9)
}
  0x2a   : > { %672 = dma.hbm_to_vmem [thread:$0]  (!%p908_p13), %s904_s12, 128, %s912_s14, %s188_s16  }
  0x2b   : > { %p1135_p0 = scmp.lt.s32.totalorder %s807_s21, 3  ;;  %p1136_p1 = scmp.ge.s32.totalorder %s807_s21, 1 }
  0x2d   : > { %p204_p3 = pnand %p1136_p1, %p1135_p0 }
  0x2e   : > { %s946_s13 = sand.u32 (!%p204_p3), 1, %s799_s19  }
  0x2f   : > { %207 = sbr.rel (%p204_p3) target bundleno = 125 (0x7d), region = 40  ;;  %s596_s17 = sshll.u32 (!%p204_p3), %s946_s13, 3 }
  0x30   : > { %s210_s23 = scalar_lea.sflag (!%p204_p3), [#allocation3], %s946_s13  ;;  %s213_s15 = scalar_lea.vmem (!%p204_p3), [#allocation2], %s596_s17 }
  0x36   : > { %786 = dma.done.wait (%p884_p6), %s210_s23, 128  }
  0x37   : > { %788 = vsyncadd (%p884_p6), %s210_s23, 4294967168  ;;  %v240_v0 = vld [vmem:[%s213_s15] sm:$0xff]  ;;  %s239_s29 = scalar_lea.vmem [#allocation5], %s596_s17  ;;  %s662_s10 = sshll.u32 %s862_s22, 7 }
  0x38   : > { %v598_v1 = vld [vmem:[%s1124_s1] ss:$0 sm:$0xff]  ;;  %v601_v4 = vld [vmem:[%s1124_s1 + $0x1] ss:$0 sm:$0xff]  ;;  %v604_v7 = vld [vmem:[%s1124_s1 + $0x2] ss:$0 sm:$0xff]  ;;  %s1081_s15 = scalar_lea.hbm %s1128_s5, %s662_s10 }
  0x39   : > { %v247_v2 = vmul.f32 %v598_v1, %v240_v0  ;;  %v599_v3 = vld [vmem:[%s1125_s2] ss:$0 sm:$0xff]  ;;  %v266_v5 = vmul.f32 %v601_v4, %v240_v0  ;;  %v602_v6 = vld [vmem:[%s1125_s2 + $0x1] ss:$0 sm:$0xff]  ;;  %v286_v9 = vmul.f32 %v604_v7, %v240_v0  ;;  %v605_v10 = vld [vmem:[%s1125_s2 + $0x2] ss:$0 sm:$0xff] }
  0x3a   : > { %v607_v11 = vld [vmem:[%s1124_s1 + $0x3] ss:$0 sm:$0xff]  ;;  %v600_v12 = vld [vmem:[%s1126_s3] ss:$0 sm:$0xff]  ;;  %v603_v17 = vld [vmem:[%s1126_s3 + $0x1] ss:$0 sm:$0xff] }
  0x3b   : > { %v253_v8 = vadd.f32 %v599_v3, %v247_v2  ;;  %v272_v13 = vadd.f32 %v602_v6, %v266_v5  ;;  %v306_v14 = vmul.f32 %v607_v11, %v240_v0  ;;  %v608_v15 = vld [vmem:[%s1125_s2 + $0x3] ss:$0 sm:$0xff]  ;;  %v292_v18 = vadd.f32 %v605_v10, %v286_v9  ;;  %v606_v20 = vld [vmem:[%s1126_s3 + $0x2] ss:$0 sm:$0xff]  ;;  %v610_v31 = vld [vmem:[%s1127_s4] ss:$0 sm:$0xff] }
  0x3c   : > { %v609_v24 = vld [vmem:[%s1126_s3 + $0x3] ss:$0 sm:$0xff]  ;;  %v612_v34 = vld [vmem:[%s1124_s1 + $0x4] ss:$0 sm:$0xff]  ;;  %v618_v35 = vld [vmem:[%s1124_s1 + $0x5] ss:$0 sm:$0xff] }
  0x3d   : > { %v254_v16 = vmax.f32 %v253_v8, 0.0  ;;  %v273_v19 = vmax.f32 %v272_v13, 0.0  ;;  %v312_v21 = vadd.f32 %v608_v15, %v306_v14  ;;  %v293_v23 = vmax.f32 %v292_v18, 0.0  ;;  %v624_v36 = vld [vmem:[%s1124_s1 + $0x6] ss:$0 sm:$0xff]  ;;  %s520_s9 = sshll.u32 %s239_s29, 4  ;;  %s1076_s9 = int_to_ptr.vmem [resolvable:$true] %s520_s9 }
  0x3e   : > { %v630_v37 = vld [vmem:[%s1124_s1 + $0x7] ss:$0 sm:$0xff]  ;;  %v614_v39 = vld [vmem:[%s1125_s2 + $0x4] ss:$0 sm:$0xff]  ;;  %v620_v40 = vld [vmem:[%s1125_s2 + $0x5] ss:$0 sm:$0xff] }
  0x3f   : > { %v260_v22 = vmul.f32 %v600_v12, %v254_v16  ;;  %v279_v25 = vmul.f32 %v603_v17, %v273_v19  ;;  %v313_v26 = vmax.f32 %v312_v21, 0.0  ;;  %v299_v27 = vmul.f32 %v606_v20, %v293_v23  ;;  %v626_v41 = vld [vmem:[%s1125_s2 + $0x6] ss:$0 sm:$0xff]  ;;  %v632_v42 = vld [vmem:[%s1125_s2 + $0x7] ss:$0 sm:$0xff]  ;;  %s507_s12 = scalar_lea.sflag [#allocation4], %s946_s13 }
  0x40   : > { %v616_v51 = vld [vmem:[%s1126_s3 + $0x4] ss:$0 sm:$0xff]  ;;  %v622_v52 = vld [vmem:[%s1126_s3 + $0x5] ss:$0 sm:$0xff]  ;;  %v628_v53 = vld [vmem:[%s1126_s3 + $0x6] ss:$0 sm:$0xff] }
  0x41   : > { %v280_v28 = vadd.f32 %v279_v25, %v260_v22  ;;  %v319_v29 = vmul.f32 %v609_v24, %v313_v26  ;;  %v634_v58 = vld [vmem:[%s1126_s3 + $0x7] ss:$0 sm:$0xff]  ;;  %v635_v1 = vld [vmem:[%s1127_s4 + $0x1] ss:$0 sm:$0xff]  ;;  %v637_v4 = vld [vmem:[%s1124_s1 + $0x8] ss:$0 sm:$0xff] }
  0x42   : > { %v643_v5 = vld [vmem:[%s1124_s1 + $0x9] ss:$0 sm:$0xff]  ;;  %v649_v6 = vld [vmem:[%s1124_s1 + $0xa] ss:$0 sm:$0xff]  ;;  %v655_v7 = vld [vmem:[%s1124_s1 + $0xb] ss:$0 sm:$0xff] }
  0x43   : > { %v300_v30 = vadd.f32 %v299_v27, %v280_v28  ;;  %v639_v9 = vld [vmem:[%s1125_s2 + $0x8] ss:$0 sm:$0xff]  ;;  %v645_v10 = vld [vmem:[%s1125_s2 + $0x9] ss:$0 sm:$0xff]  ;;  %v651_v11 = vld [vmem:[%s1125_s2 + $0xa] ss:$0 sm:$0xff] }
  0x44   : > { %v657_v12 = vld [vmem:[%s1125_s2 + $0xb] ss:$0 sm:$0xff]  ;;  %v641_v21 = vld [vmem:[%s1126_s3 + $0x8] ss:$0 sm:$0xff]  ;;  %v647_v22 = vld [vmem:[%s1126_s3 + $0x9] ss:$0 sm:$0xff] }
  0x45   : > { %v320_v32 = vadd.f32 %v319_v29, %v300_v30  ;;  %v653_v23 = vld [vmem:[%s1126_s3 + $0xa] ss:$0 sm:$0xff]  ;;  %v659_v28 = vld [vmem:[%s1126_s3 + $0xb] ss:$0 sm:$0xff]  ;;  %s741_s14 = scalar_lea.vmem %s1076_s9, 128  ;;  %p1137_p11 = scmp.ne.s32.totalorder %s1132_s30, 0 }
  0x46   : > { %p742_p6 = scmp.ne.s32.totalorder %s1076_s9, %s741_s14  ;;  %s810_s22 = smov [#allocation5]  }
  0x47   : > { %v325_v33 = vadd.f32 %v610_v31, %v320_v32  ;;  %s745_s17 = sshll.u32 %s810_s22, 4  ;;  %s746_s17 = int_to_ptr.vmem [resolvable:$false] %s745_s17 }
  0x48   : > { %p743_p12 = pnand %p742_p6, %p1137_p11  ;;  %s747_s16 = scalar_lea.vmem %s746_s17, 256 }
  0x49   : > { %v326_v38 = vadd.f32 %v325_v33, %v240_v0  ;;  %p748_p7 = scmp.lt.s32.totalorder %s1076_s9, %s746_s17  ;;  %p749_p10 = scmp.lt.s32.totalorder %s747_s16, %s741_s14 }
  0x4a   : > { %p744_p13 = pneg %p743_p12 }
  0x4b   : > { %v334_v43 = vmul.f32 %v612_v34, %v326_v38  ;;  %v355_v44 = vmul.f32 %v618_v35, %v326_v38  ;;  %v375_v45 = vmul.f32 %v624_v36, %v326_v38  ;;  %v395_v46 = vmul.f32 %v630_v37, %v326_v38  ;;  %v660_v35 = vld [vmem:[%s1127_s4 + $0x2] ss:$0 sm:$0xff]  ;;  %p750_p2 = por %p749_p10, %p748_p7 }
  0x4d   : > { %v341_v47 = vadd.f32 %v614_v39, %v334_v43  ;;  %v361_v48 = vadd.f32 %v620_v40, %v355_v44  ;;  %v381_v49 = vadd.f32 %v626_v41, %v375_v45  ;;  %v401_v50 = vadd.f32 %v632_v42, %v395_v46  ;;  %p751_p4 = pnand %p750_p2, %p744_p13 }
  0x4f   : > { %v342_v54 = vmax.f32 %v341_v47, 0.0  ;;  %v362_v55 = vmax.f32 %v361_v48, 0.0  ;;  %v382_v56 = vmax.f32 %v381_v49, 0.0  ;;  %v402_v57 = vmax.f32 %v401_v50, 0.0 }
  0x51   : > { %v349_v59 = vmul.f32 %v616_v51, %v342_v54  ;;  %v368_v60 = vmul.f32 %v622_v52, %v362_v55  ;;  %v388_v61 = vmul.f32 %v628_v53, %v382_v56  ;;  %v408_v63 = vmul.f32 %v634_v58, %v402_v57 }
  0x53   : > { %v369_v62 = vadd.f32 %v368_v60, %v349_v59 }
  0x55   : > { %v389_v0 = vadd.f32 %v388_v61, %v369_v62 }
  0x57   : > { %v409_v2 = vadd.f32 %v408_v63, %v389_v0 }
  0x59   : > { %v414_v3 = vadd.f32 %v635_v1, %v409_v2 }
  0x5b   : > { %v415_v8 = vadd.f32 %v414_v3, %v326_v38 }
  0x5d   : > { %v423_v13 = vmul.f32 %v637_v4, %v415_v8  ;;  %v444_v14 = vmul.f32 %v643_v5, %v415_v8  ;;  %v464_v15 = vmul.f32 %v649_v6, %v415_v8  ;;  %v484_v16 = vmul.f32 %v655_v7, %v415_v8 }
  0x5f   : > { %v430_v17 = vadd.f32 %v639_v9, %v423_v13  ;;  %v450_v18 = vadd.f32 %v645_v10, %v444_v14  ;;  %v470_v19 = vadd.f32 %v651_v11, %v464_v15  ;;  %v490_v20 = vadd.f32 %v657_v12, %v484_v16 }
  0x61   : > { %v431_v24 = vmax.f32 %v430_v17, 0.0  ;;  %v451_v25 = vmax.f32 %v450_v18, 0.0  ;;  %v471_v26 = vmax.f32 %v470_v19, 0.0  ;;  %v491_v27 = vmax.f32 %v490_v20, 0.0 }
  0x63   : > { %v438_v29 = vmul.f32 %v641_v21, %v431_v24  ;;  %v457_v30 = vmul.f32 %v647_v22, %v451_v25  ;;  %v477_v31 = vmul.f32 %v653_v23, %v471_v26  ;;  %v497_v33 = vmul.f32 %v659_v28, %v491_v27 }
  0x65   : > { %v458_v32 = vadd.f32 %v457_v30, %v438_v29 }
  0x67   : > { %v478_v34 = vadd.f32 %v477_v31, %v458_v32 }
  0x69   : > { %v498_v36 = vadd.f32 %v497_v33, %v478_v34 }
  0x6b   : > { %v503_v37 = vadd.f32 %v660_v35, %v498_v36 }
  0x6d   : > { %v504_v38 = vadd.f32 %v503_v37, %v415_v8 }
  0x6f   : > { %505 = vst [vmem:[%s239_s29] sm:$0xff] %v504_v38 }
  0x70   : > { %754 = shalt.err (!%p751_p4)
}
  0x71   : > { %s755_s13 = scalar_lea.hbm %s1081_s15, 128  ;;  %s759_s28 = scalar_lea.hbm %s1128_s5, 256 }
  0x72   : > { %p756_p5 = scmp.ne.s32.totalorder %s1081_s15, %s755_s13  ;;  %p760_p0 = scmp.lt.u32.totalorder %s1081_s15, %s1128_s5 }
  0x73   : > { %p761_p1 = scmp.lt.u32.totalorder %s759_s28, %s755_s13  ;;  %p763_p6 = scmp.lt.u32.totalorder %s755_s13, %s1081_s15 }
  0x74   : > { %p757_p8 = pnand %p756_p5, %p1137_p11 }
  0x75   : > { %p762_p3 = por %p761_p1, %p760_p0 }
  0x76   : > { %p758_p9 = pneg %p757_p8 }
  0x77   : > { %p764_p12 = por %p763_p6, %p762_p3 }
  0x79   : > { %p765_p13 = pnand %p764_p12, %p758_p9 }
  0x7b   : > { %768 = shalt.err (!%p765_p13)
}
  0x7c   : > { %667 = dma.vmem_to_hbm [thread:$0]  (%p1137_p11), %s1076_s9, 128, %s1081_s15, %s507_s12  }
  0x7d PF: > { %s532_s29 = sand.u32 1, %s795_s18   ;;  %p1138_p7 = scmp.ne.s32.totalorder %s1133_s6, 0 }
  0x7e   : > { %p1139_p10 = scmp.ge.s32.totalorder %s807_s21, 2  ;;  %s533_s10 = scalar_lea.sflag [#allocation4], %s532_s29 }
  0x80   : > { %p674_p2 = pnand %p1139_p10, %p1138_p7 }
  0x82   : > { %790 = dma.done.wait (!%p674_p2), %s533_s10, 128  }
  0x83   : > { %792 = vsyncadd (!%p674_p2), %s533_s10, 4294967168  ;;  %p18_p4 = scmp.ge.s32.totalorder %s866_s24, 4   ;;  %s1140_s18 = smov %s799_s19 }
  0x84   : > { %s1141_s19 = smov %s803_s20  ;;  %s1142_s20 = smov %s878_s27 }
  0x85   : > { %s1143_s21 = smov %s866_s24  ;;  %20 = sbr.rel (!%p18_p4) target bundleno = 5 (0x5), region = 91 }
  0x8c   :  { %538 = vsyncpa [#allocation3], 1 }
  0x8d   :  { %540 = vsyncpa [#allocation3 + $0x1], 1 }
  0x8e   :  { %541 = vsyncpa [#allocation4], 1 }
  0x8f   :  { %543 = vsyncpa [#allocation4 + $0x1], 1 }

</bundles_post_ra>
